<compile_context>
chip_gen: v6e
topology: v6e:2x2x1
jax: 0.10.0
libtpu: 0.0.40
codegen_flags: <defaults>
</compile_context>

<pallas_src>
import functools

import jax
import jax.numpy as jnp
from jax.experimental import pallas as pl
from jax.experimental.pallas import tpu as pltpu

STATE_DIM = 17            # walker-style small dims
ACTION_DIM = 6
DIN = STATE_DIM + ACTION_DIM      # 23
DINP = 32                         # padded K (multiple of bf16 sublane pack of 16)
H1, H2 = 400, 300                 # logical (PyTorch) hidden sizes
H1P, H2P = 512, 384               # lane-aligned padded sizes (multiples of 128)


def _critic_kernel(sa_ref, w1_ref, b1_ref, w2_ref, b2_ref, w3_ref, b3_ref, out_ref):
    # sa_ref: (bt, DINP) f32          w1_ref: (DINP, 2*H1P) bf16   b1_ref: (1, 2*H1P) f32
    # w2_ref: (2, H1P, H2P) bf16      b2_ref: (2, 1, H2P) f32
    # w3_ref: (2, 1, H2P) bf16        b3_ref: (1, 2) f32
    # out_ref: (bt, 2) f32
    sa_bf = sa_ref[...].astype(jnp.bfloat16)

    # Layer 1 for BOTH critics at once (columns [0:512)=critic0, [512:1024)=critic1).
    h1 = jnp.dot(sa_bf, w1_ref[...], preferred_element_type=jnp.float32) + b1_ref[...]
    h1 = jnp.maximum(h1, 0.0).astype(jnp.bfloat16)                  # (bt, 2*H1P)

    for c in range(2):  # unrolled at trace time
        h1_c = h1[:, c * H1P:(c + 1) * H1P]                         # lane-aligned slice
        h2 = jnp.dot(h1_c, w2_ref[c], preferred_element_type=jnp.float32) + b2_ref[c]
        h2 = jnp.maximum(h2, 0.0)                                   # (bt, H2P) f32
        # Final 300->1 layer as a VPU multiply + cross-lane reduction (no N=1 MXU matmul).
        w3_row = w3_ref[c].astype(jnp.float32)                      # (1, H2P)
        q_c = jnp.sum(h2 * w3_row, axis=-1, keepdims=True) + b3_ref[:, c:c + 1]
        out_ref[:, c:c + 1] = q_c.astype(out_ref.dtype)             # direct column write


@functools.partial(jax.jit, static_argnames=("b_tile",))
def critic_forward(state, action, params, *, b_tile=256):
    """Runs both critics in one pallas_call. Returns (q1, q2), each (B, 1) f32."""
    B = state.shape[0]
    # Pack [state | action | zero-pad] into a single lane-padded (B, DINP) f32 slab.
    sa = jnp.concatenate(
        [state.astype(jnp.float32), action.astype(jnp.float32),
         jnp.zeros((B, DINP - DIN), jnp.float32)], axis=1)

    # Batch tile: multiple of 16 (bf16 packs 16 sublanes/vreg), capped at b_tile.
    if B >= b_tile:
        bt = b_tile
    else:
        bt = max(8, ((B + 15) // 16) * 16)
    n_tiles = pl.cdiv(B, bt)
    Bp = n_tiles * bt
    if Bp != B:
        sa = jnp.pad(sa, ((0, Bp - B), (0, 0)))

    weight_bytes = sum(int(p.size) * p.dtype.itemsize for p in params.values())
    cost = pl.CostEstimate(
        flops=2 * Bp * (DINP * 2 * H1P + 2 * H1P * H2P + 2 * H2P),
        transcendentals=0,
        bytes_accessed=weight_bytes + Bp * (DINP + 2) * 4,
    )

    out = pl.pallas_call(
        _critic_kernel,
        out_shape=jax.ShapeDtypeStruct((Bp, 2), jnp.float32),
        grid=(n_tiles,),
        in_specs=[
            # Activations stream per batch tile.
            pl.BlockSpec((bt, DINP), lambda i: (i, 0)),
            # Weights/biases: constant block index -> fetched once, VMEM-resident.
            pl.BlockSpec((DINP, 2 * H1P), lambda i: (0, 0)),
            pl.BlockSpec((1, 2 * H1P), lambda i: (0, 0)),
            pl.BlockSpec((2, H1P, H2P), lambda i: (0, 0, 0)),
            pl.BlockSpec((2, 1, H2P), lambda i: (0, 0, 0)),
            pl.BlockSpec((2, 1, H2P), lambda i: (0, 0, 0)),
            pl.BlockSpec((1, 2), lambda i: (0, 0)),
        ],
        out_specs=pl.BlockSpec((bt, 2), lambda i: (i, 0)),
        compiler_params=pltpu.CompilerParams(
            dimension_semantics=("parallel",)),   # v7x: split batch tiles across the 2 TCs
        cost_estimate=cost,
    )(sa, params["w1"], params["b1"], params["w2"], params["b2"],
      params["w3"], params["b3"])
    return out[:B, 0:1], out[:B, 1:2]


def init_raw_params(key, state_dim, action_dim):
    """PyTorch-Linear-style params (unpadded, f32), stacked over the 2 critics."""
    din = state_dim + action_dim
    ks = jax.random.split(key, 6)

    def u(k, shape, fan_in):
        b = 1.0 / jnp.sqrt(fan_in)
        return jax.random.uniform(k, shape, jnp.float32, -b, b)

    return {
        "w1": u(ks[0], (2, din, H1), din), "b1": u(ks[1], (2, H1), din),
        "w2": u(ks[2], (2, H1, H2), H1),  "b2": u(ks[3], (2, H2), H1),
        "w3": u(ks[4], (2, H2, 1), H2),   "b3": u(ks[5], (2, 1), H2),
    }


def pack_params(raw):
    """Zero-pad to lane-aligned shapes, cast weights to bf16, fuse layer 1 over critics."""
    # Layer 1: pad K 23->32 and N 400->512, fuse critics along the output axis.
    w1_pad = jnp.zeros((2, DINP, H1P), jnp.float32).at[:, :DIN, :H1].set(raw["w1"])
    w1 = jnp.concatenate([w1_pad[0], w1_pad[1]], axis=1).astype(jnp.bfloat16)  # (32, 1024)
    b1 = (jnp.zeros((2, H1P), jnp.float32).at[:, :H1].set(raw["b1"])
          .reshape(1, 2 * H1P))                                                 # (1, 1024)
    # Layer 2: pad (400,300) -> (512,384); padded rows/cols are exact zeros.
    w2 = (jnp.zeros((2, H1P, H2P), jnp.float32)
          .at[:, :H1, :H2].set(raw["w2"]).astype(jnp.bfloat16))                 # (2,512,384)
    b2 = jnp.zeros((2, 1, H2P), jnp.float32).at[:, 0, :H2].set(raw["b2"])
    # Layer 3: row vector per critic for the VPU reduction.
    w3 = (jnp.zeros((2, 1, H2P), jnp.float32)
          .at[:, 0, :H2].set(raw["w3"][..., 0]).astype(jnp.bfloat16))           # (2,1,384)
    b3 = raw["b3"].reshape(1, 2).astype(jnp.float32)                            # (1, 2)
    return {"w1": w1, "b1": b1, "w2": w2, "b2": b2, "w3": w3, "b3": b3}


def _reference_quant(state, action, packed):
    """Pure-JAX reference mirroring the kernel's bf16 quantization (f32 math)."""
    B = state.shape[0]
    sa = jnp.concatenate([state.astype(jnp.float32), action.astype(jnp.float32),
                          jnp.zeros((B, DINP - DIN), jnp.float32)], axis=1)
    sa = sa.astype(jnp.bfloat16).astype(jnp.float32)
    h1 = sa @ packed["w1"].astype(jnp.float32) + packed["b1"]
    h1 = jnp.maximum(h1, 0.0).astype(jnp.bfloat16).astype(jnp.float32)
    qs = []
    for c in range(2):
        h1c = h1[:, c * H1P:(c + 1) * H1P]
        h2 = jnp.maximum(h1c @ packed["w2"][c].astype(jnp.float32) + packed["b2"][c], 0.0)
        qs.append(jnp.sum(h2 * packed["w3"][c].astype(jnp.float32),
                          axis=-1, keepdims=True) + packed["b3"][:, c:c + 1])
    return qs[0], qs[1]


def _reference_f32(state, action, raw):
    """Exact f32 PyTorch Critic forward (no quantization)."""
    sa = jnp.concatenate([state, action], axis=1)
    qs = []
    for c in range(2):
        h1 = jnp.maximum(sa @ raw["w1"][c] + raw["b1"][c], 0.0)
        h2 = jnp.maximum(h1 @ raw["w2"][c] + raw["b2"][c], 0.0)
        qs.append(h2 @ raw["w3"][c] + raw["b3"][c])
    return qs[0], qs[1]


if __name__ == "__main__":
    key = jax.random.PRNGKey(0)
    kp, ks, ka, ks2, ka2 = jax.random.split(key, 5)

    raw = init_raw_params(kp, STATE_DIM, ACTION_DIM)
    params = pack_params(raw)

    # Small-batch case (single-tile grid).
    B = 8
    state = jax.random.normal(ks, (B, STATE_DIM), jnp.float32)
    action = jax.random.normal(ka, (B, ACTION_DIM), jnp.float32)
    q1, q2 = critic_forward(state, action, params)
    jax.block_until_ready((q1, q2))

    r1, r2 = _reference_quant(state, action, params)
    f1, f2 = _reference_f32(state, action, raw)
    assert q1.shape == (B, 1) and q2.shape == (B, 1)
    assert jnp.allclose(q1, r1, atol=1e-3, rtol=1e-3)
    assert jnp.allclose(q2, r2, atol=1e-3, rtol=1e-3)
    # Parity with the f32 PyTorch model is limited by bf16 weight quantization.
    assert jnp.allclose(q1, f1, atol=5e-2, rtol=5e-2)
    assert jnp.allclose(q2, f2, atol=5e-2, rtol=5e-2)

    # Multi-tile case: exercises the batch grid with VMEM-resident weights.
    B2 = 48
    state2 = jax.random.normal(ks2, (B2, STATE_DIM), jnp.float32)
    action2 = jax.random.normal(ka2, (B2, ACTION_DIM), jnp.float32)
    p1, p2 = critic_forward(state2, action2, params, b_tile=16)
    jax.block_until_ready((p1, p2))
    rr1, rr2 = _reference_quant(state2, action2, params)
    assert p1.shape == (B2, 1) and p2.shape == (B2, 1)
    assert jnp.allclose(p1, rr1, atol=1e-3, rtol=1e-3)
    assert jnp.allclose(p2, rr2, atol=1e-3, rtol=1e-3)

    print("KERNEL_OK")
</pallas_src>

<mosaic_0001>
module attributes {stable_mosaic.version = 11 : i64} {
  func.func @_critic_kernel(%arg0: i32, %arg1: memref<16x32xf32, #tpu.memory_space<vmem>>, %arg2: memref<32x1024xbf16, #tpu.memory_space<vmem>>, %arg3: memref<1x1024xf32, #tpu.memory_space<vmem>>, %arg4: memref<2x512x384xbf16, #tpu.memory_space<vmem>>, %arg5: memref<2x1x384xf32, #tpu.memory_space<vmem>>, %arg6: memref<2x1x384xbf16, #tpu.memory_space<vmem>>, %arg7: memref<1x2xf32, #tpu.memory_space<vmem>>, %arg8: memref<16x2xf32, #tpu.memory_space<vmem>>) attributes {dimension_semantics = [#tpu.dimension_semantics<parallel>], iteration_bounds = array<i64: 1>, scalar_prefetch = 0 : i64, scratch_operands = 0 : i64, tpu.core_type = #tpu.core_type<tc>, window_params = [{transform_indices = @transform_0, window_bounds = array<i64: 16, 32>}, {pipeline_mode = #tpu.pipeline_mode<synchronous>, transform_indices = @transform_1, window_bounds = array<i64: 32, 1024>}, {pipeline_mode = #tpu.pipeline_mode<synchronous>, transform_indices = @transform_2, window_bounds = array<i64: 1, 1024>}, {pipeline_mode = #tpu.pipeline_mode<synchronous>, transform_indices = @transform_3, window_bounds = array<i64: 2, 512, 384>}, {pipeline_mode = #tpu.pipeline_mode<synchronous>, transform_indices = @transform_4, window_bounds = array<i64: 2, 1, 384>}, {pipeline_mode = #tpu.pipeline_mode<synchronous>, transform_indices = @transform_5, window_bounds = array<i64: 2, 1, 384>}, {pipeline_mode = #tpu.pipeline_mode<synchronous>, transform_indices = @transform_6, window_bounds = array<i64: 1, 2>}, {transform_indices = @transform_7, window_bounds = array<i64: 16, 2>}]} {
    %c0 = arith.constant 0 : index
    %c0_0 = arith.constant 0 : index
    %0 = vector.load %arg1[%c0, %c0_0] : memref<16x32xf32, #tpu.memory_space<vmem>>, vector<16x32xf32>
    %1 = arith.truncf %0 : vector<16x32xf32> to vector<16x32xbf16>
    %c0_1 = arith.constant 0 : index
    %c0_2 = arith.constant 0 : index
    %2 = vector.load %arg2[%c0_1, %c0_2] : memref<32x1024xbf16, #tpu.memory_space<vmem>>, vector<32x1024xbf16>
    %cst = arith.constant dense<0.000000e+00> : vector<16x1024xf32>
    %3 = tpu.matmul %1, %2, %cst {dimension_numbers = #tpu.dot_dimension_numbers<[1], [0], [0], [1], [0, 0, 1, 1], [], []>} : vector<16x32xbf16>, vector<32x1024xbf16>, vector<16x1024xf32> -> vector<16x1024xf32>
    %c0_3 = arith.constant 0 : index
    %c0_4 = arith.constant 0 : index
    %4 = vector.load %arg3[%c0_3, %c0_4] : memref<1x1024xf32, #tpu.memory_space<vmem>>, vector<1x1024xf32>
    %5 = vector.broadcast %4 : vector<1x1024xf32> to vector<16x1024xf32>
    %6 = arith.addf %3, %5 : vector<16x1024xf32>
    %cst_5 = arith.constant 0.000000e+00 : f32
    %7 = vector.broadcast %cst_5 : f32 to vector<16x1024xf32>
    %8 = arith.maximumf %6, %7 : vector<16x1024xf32>
    %9 = arith.truncf %8 : vector<16x1024xf32> to vector<16x1024xbf16>
    %10 = vector.extract_strided_slice %9 {offsets = [0, 0], sizes = [16, 512], strides = [1, 1]} : vector<16x1024xbf16> to vector<16x512xbf16>
    %c0_6 = arith.constant 0 : index
    %c0_7 = arith.constant 0 : index
    %c0_8 = arith.constant 0 : index
    %11 = vector.load %arg4[%c0_6, %c0_7, %c0_8] : memref<2x512x384xbf16, #tpu.memory_space<vmem>>, vector<1x512x384xbf16>
    %12 = vector.shape_cast %11 : vector<1x512x384xbf16> to vector<512x384xbf16>
    %cst_9 = arith.constant dense<0.000000e+00> : vector<16x384xf32>
    %13 = tpu.matmul %10, %12, %cst_9 {dimension_numbers = #tpu.dot_dimension_numbers<[1], [0], [0], [1], [0, 0, 1, 1], [], []>} : vector<16x512xbf16>, vector<512x384xbf16>, vector<16x384xf32> -> vector<16x384xf32>
    %c0_10 = arith.constant 0 : index
    %c0_11 = arith.constant 0 : index
    %c0_12 = arith.constant 0 : index
    %14 = vector.load %arg5[%c0_10, %c0_11, %c0_12] : memref<2x1x384xf32, #tpu.memory_space<vmem>>, vector<1x1x384xf32>
    %15 = vector.shape_cast %14 : vector<1x1x384xf32> to vector<1x384xf32>
    %16 = vector.broadcast %15 : vector<1x384xf32> to vector<16x384xf32>
    %17 = arith.addf %13, %16 : vector<16x384xf32>
    %cst_13 = arith.constant 0.000000e+00 : f32
    %18 = vector.broadcast %cst_13 : f32 to vector<16x384xf32>
    %19 = arith.maximumf %17, %18 : vector<16x384xf32>
    %c0_14 = arith.constant 0 : index
    %c0_15 = arith.constant 0 : index
    %c0_16 = arith.constant 0 : index
    %20 = vector.load %arg6[%c0_14, %c0_15, %c0_16] : memref<2x1x384xbf16, #tpu.memory_space<vmem>>, vector<1x1x384xbf16>
    %21 = vector.shape_cast %20 : vector<1x1x384xbf16> to vector<1x384xbf16>
    %22 = arith.extf %21 : vector<1x384xbf16> to vector<1x384xf32>
    %23 = vector.broadcast %22 : vector<1x384xf32> to vector<16x384xf32>
    %24 = arith.mulf %19, %23 : vector<16x384xf32>
    %cst_17 = arith.constant dense<0.000000e+00> : vector<16xf32>
    %25 = vector.multi_reduction <add>, %24, %cst_17 [1] : vector<16x384xf32> to vector<16xf32>
    %26 = vector.shape_cast %25 : vector<16xf32> to vector<16x1xf32>
    %c0_18 = arith.constant 0 : index
    %c0_19 = arith.constant 0 : index
    %27 = vector.load %arg7[%c0_18, %c0_19] : memref<1x2xf32, #tpu.memory_space<vmem>>, vector<1x1xf32>
    %28 = vector.broadcast %27 : vector<1x1xf32> to vector<16x1xf32>
    %29 = arith.addf %26, %28 : vector<16x1xf32>
    %c0_20 = arith.constant 0 : index
    %c0_21 = arith.constant 0 : index
    %30 = vector.load %arg8[%c0_20, %c0_21] : memref<16x2xf32, #tpu.memory_space<vmem>>, vector<16x1xf32>
    tpu.vector_store %arg8[%c0_20, %c0_21], %29 {strides = array<i32>} : memref<16x2xf32, #tpu.memory_space<vmem>>, vector<16x1xf32>,
    %31 = vector.extract_strided_slice %9 {offsets = [0, 512], sizes = [16, 512], strides = [1, 1]} : vector<16x1024xbf16> to vector<16x512xbf16>
    %c1 = arith.constant 1 : index
    %c0_22 = arith.constant 0 : index
    %c0_23 = arith.constant 0 : index
    %32 = vector.load %arg4[%c1, %c0_22, %c0_23] : memref<2x512x384xbf16, #tpu.memory_space<vmem>>, vector<1x512x384xbf16>
    %33 = vector.shape_cast %32 : vector<1x512x384xbf16> to vector<512x384xbf16>
    %cst_24 = arith.constant dense<0.000000e+00> : vector<16x384xf32>
    %34 = tpu.matmul %31, %33, %cst_24 {dimension_numbers = #tpu.dot_dimension_numbers<[1], [0], [0], [1], [0, 0, 1, 1], [], []>} : vector<16x512xbf16>, vector<512x384xbf16>, vector<16x384xf32> -> vector<16x384xf32>
    %c1_25 = arith.constant 1 : index
    %c0_26 = arith.constant 0 : index
    %c0_27 = arith.constant 0 : index
    %35 = vector.load %arg5[%c1_25, %c0_26, %c0_27] : memref<2x1x384xf32, #tpu.memory_space<vmem>>, vector<1x1x384xf32>
    %36 = vector.shape_cast %35 : vector<1x1x384xf32> to vector<1x384xf32>
    %37 = vector.broadcast %36 : vector<1x384xf32> to vector<16x384xf32>
    %38 = arith.addf %34, %37 : vector<16x384xf32>
    %cst_28 = arith.constant 0.000000e+00 : f32
    %39 = vector.broadcast %cst_28 : f32 to vector<16x384xf32>
    %40 = arith.maximumf %38, %39 : vector<16x384xf32>
    %c1_29 = arith.constant 1 : index
    %c0_30 = arith.constant 0 : index
    %c0_31 = arith.constant 0 : index
    %41 = vector.load %arg6[%c1_29, %c0_30, %c0_31] : memref<2x1x384xbf16, #tpu.memory_space<vmem>>, vector<1x1x384xbf16>
    %42 = vector.shape_cast %41 : vector<1x1x384xbf16> to vector<1x384xbf16>
    %43 = arith.extf %42 : vector<1x384xbf16> to vector<1x384xf32>
    %44 = vector.broadcast %43 : vector<1x384xf32> to vector<16x384xf32>
    %45 = arith.mulf %40, %44 : vector<16x384xf32>
    %cst_32 = arith.constant dense<0.000000e+00> : vector<16xf32>
    %46 = vector.multi_reduction <add>, %45, %cst_32 [1] : vector<16x384xf32> to vector<16xf32>
    %47 = vector.shape_cast %46 : vector<16xf32> to vector<16x1xf32>
    %c0_33 = arith.constant 0 : index
    %c1_34 = arith.constant 1 : index
    %48 = vector.load %arg7[%c0_33, %c1_34] : memref<1x2xf32, #tpu.memory_space<vmem>>, vector<1x1xf32>
    %49 = vector.broadcast %48 : vector<1x1xf32> to vector<16x1xf32>
    %50 = arith.addf %47, %49 : vector<16x1xf32>
    %c0_35 = arith.constant 0 : index
    %c1_36 = arith.constant 1 : index
    %51 = vector.load %arg8[%c0_35, %c1_36] : memref<16x2xf32, #tpu.memory_space<vmem>>, vector<16x1xf32>
    tpu.vector_store %arg8[%c0_35, %c1_36], %50 {strides = array<i32>} : memref<16x2xf32, #tpu.memory_space<vmem>>, vector<16x1xf32>,
    return
  }
  func.func @transform_0(%arg0: i32) -> (i32, i32) {
    %c0_i32 = arith.constant 0 : i32
    %c0_i32_0 = arith.constant 0 : i32
    return %arg0, %c0_i32 : i32, i32
  }
  func.func @transform_1(%arg0: i32) -> (i32, i32) {
    %c0_i32 = arith.constant 0 : i32
    %c0_i32_0 = arith.constant 0 : i32
    %c0_i32_1 = arith.constant 0 : i32
    return %c0_i32, %c0_i32_0 : i32, i32
  }
  func.func @transform_2(%arg0: i32) -> (i32, i32) {
    %c0_i32 = arith.constant 0 : i32
    %c0_i32_0 = arith.constant 0 : i32
    %c0_i32_1 = arith.constant 0 : i32
    return %c0_i32, %c0_i32_0 : i32, i32
  }
  func.func @transform_3(%arg0: i32) -> (i32, i32, i32) {
    %c0_i32 = arith.constant 0 : i32
    %c0_i32_0 = arith.constant 0 : i32
    %c0_i32_1 = arith.constant 0 : i32
    %c0_i32_2 = arith.constant 0 : i32
    return %c0_i32, %c0_i32_0, %c0_i32_1 : i32, i32, i32
  }
  func.func @transform_4(%arg0: i32) -> (i32, i32, i32) {
    %c0_i32 = arith.constant 0 : i32
    %c0_i32_0 = arith.constant 0 : i32
    %c0_i32_1 = arith.constant 0 : i32
    %c0_i32_2 = arith.constant 0 : i32
    return %c0_i32, %c0_i32_0, %c0_i32_1 : i32, i32, i32
  }
  func.func @transform_5(%arg0: i32) -> (i32, i32, i32) {
    %c0_i32 = arith.constant 0 : i32
    %c0_i32_0 = arith.constant 0 : i32
    %c0_i32_1 = arith.constant 0 : i32
    %c0_i32_2 = arith.constant 0 : i32
    return %c0_i32, %c0_i32_0, %c0_i32_1 : i32, i32, i32
  }
  func.func @transform_6(%arg0: i32) -> (i32, i32) {
    %c0_i32 = arith.constant 0 : i32
    %c0_i32_0 = arith.constant 0 : i32
    %c0_i32_1 = arith.constant 0 : i32
    return %c0_i32, %c0_i32_0 : i32, i32
  }
  func.func @transform_7(%arg0: i32) -> (i32, i32) {
    %c0_i32 = arith.constant 0 : i32
    %c0_i32_0 = arith.constant 0 : i32
    return %arg0, %c0_i32 : i32, i32
  }
}

</mosaic_0001>

<bundles_post_ra>
// kernel: critic_forward.1
= control target key start
LH: loop header
LB: loop body
LE: loop exit
PB: predicated region body
PF: predicated region fallthrough
CT: control target
= control target key end

     0   :  { %12 = vsyncpa [#allocation3], 0  ;;  %s2969_s0 = inlined_call_operand.vmem [shape: f32[16,32], index: 0, kind: input, shape index: {}]   ;;  %s2970_s1 = inlined_call_operand.hbm [shape: bf16[32,1024], index: 1, kind: input, shape index: {}]   ;;  %s2971_s2 = inlined_call_operand.vmem [shape: f32[1,1024], index: 2, kind: input, shape index: {}]   ;;  %s2972_s3 = inlined_call_operand.hbm [shape: bf16[2,512,384], index: 3, kind: input, shape index: {}]   ;;  %s2973_s4 = inlined_call_operand.vmem [shape: f32[2,1,384], index: 4, kind: input, shape index: {}]   ;;  %s2974_s5 = inlined_call_operand.vmem [shape: bf16[2,1,384], index: 5, kind: input, shape index: {}]   ;;  %s2975_s6 = inlined_call_operand.vmem [shape: f32[1,2], index: 6, kind: input, shape index: {}]   ;;  %s2976_s7 = inlined_call_operand.vmem [shape: f32[16,2], index: 7, kind: output, shape index: {}]  }
   0x1   :  { %13 = vsyncpa [#allocation5], 0  ;;  %s2790_s24 = smov [#allocation2]  }
   0x2   :  { %s21_s25 = sshll.u32 %s2790_s24, 4  ;;  %s22_s25 = int_to_ptr.vmem [resolvable:$true] %s21_s25 }
   0x3   :  { %s2754_s26 = scalar_lea.vmem %s22_s25, 2048  ;;  %p2759_p1 = scmp.lt.s32.totalorder %s22_s25, %s22_s25 }
   0x4   :  { %p2755_p0 = scmp.ne.s32.totalorder %s22_s25, %s2754_s26  ;;  %p2760_p2 = scmp.lt.s32.totalorder %s2754_s26, %s2754_s26 }
   0x6   :  { %p2761_p3 = por %p2760_p2, %p2759_p1 }
   0x8   :  { %p2762_p4 = pnand %p2761_p3, %p2755_p0 }
   0xa   :  { %2765 = shalt.err (!%p2762_p4)
}
   0xb   :  { %s2791_s27 = smov 512   ;;  %s2792_s28 = smov 32  }
   0xc   :  { %27 = dma.hbm_to_vmem [thread:$0]  %s2970_s1, 2048, %s22_s25, [#allocation3], %s2791_s27, %s2791_s27, %s2792_s28  }
   0xd   :  { %s2793_s8 = smov [#allocation4]  }
   0xe   :  { %s35_s9 = sshll.u32 %s2793_s8, 4  ;;  %s36_s9 = int_to_ptr.vmem [resolvable:$true] %s35_s9 }
   0xf   :  { %s2774_s10 = scalar_lea.vmem %s36_s9, 24576  ;;  %p2779_p6 = scmp.lt.s32.totalorder %s36_s9, %s36_s9 }
  0x10   :  { %p2775_p5 = scmp.ne.s32.totalorder %s36_s9, %s2774_s10  ;;  %p2780_p7 = scmp.lt.s32.totalorder %s2774_s10, %s2774_s10 }
  0x12   :  { %p2781_p8 = por %p2780_p7, %p2779_p6 }
  0x14   :  { %p2782_p9 = pnand %p2781_p8, %p2775_p5 }
  0x16   :  { %2785 = shalt.err (!%p2782_p9)
}
  0x17   :  { %s2794_s11 = smov 192   ;;  %s2795_s12 = smov 12  }
  0x18   :  { %41 = dma.hbm_to_vmem [thread:$0]  %s2972_s3, 24576, %s36_s9, [#allocation5], %s2794_s11, %s2794_s11, %s2795_s12  }
  0x19   :  { %2786 = dma.done.wait [#allocation3], 2048  }
  0x1a   :  { %2787 = vsyncadd [#allocation3], 4294965248 }
  0x1b   :  { %2788 = dma.done.wait [#allocation5], 24576  }
  0x1c   :  { %2789 = vsyncadd [#allocation5], 4294942720  ;;  %v2796_v0 = vmov 0   ;;  %v66_v1 = vld [vmem:[#allocation2 + $0x40] sm:$0xff]  ;;  %v67_v3 = vld [vmem:[#allocation2 + $0x48] sm:$0xff]  ;;  %vm196_vm0 = vcmask 261120  }
  0x1d   :  { %232 = vmatprep.mubr.bf16.mxu0 %v2796_v0  ;;  %275 = vmatprep.mubr.bf16.mxu1 %v2796_v0  ;;  %v70_v2 = vld [vmem:[#allocation2 + $0x60] sm:$0xff]  ;;  %v71_v5 = vld [vmem:[#allocation2 + $0x68] sm:$0xff]  ;;  %v68_v16 = vld [vmem:[#allocation2 + $0x50] sm:$0xff]  ;;  %vm1280_vm1 = vcmask 7168   ;;  %vm2170_vm2 = vcmask 15368  }
  0x1e   :  { %v2188_v4 = vcombine.high %v66_v1, %v70_v2  ;;  %v2187_v6 = vcombine.low %v66_v1, %v70_v2  ;;  %v58_v7 = vld [vmem:[#allocation2] sm:$0xff]  ;;  %v2190_v9 = vcombine.high %v67_v3, %v71_v5  ;;  %v2189_v10 = vcombine.low %v67_v3, %v71_v5  ;;  %v59_v12 = vld [vmem:[#allocation2 + $0x8] sm:$0xff]  ;;  %v72_v17 = vld [vmem:[#allocation2 + $0x70] sm:$0xff] }
  0x1f   :  { %v62_v8 = vld [vmem:[#allocation2 + $0x20] sm:$0xff]  ;;  %v63_v13 = vld [vmem:[#allocation2 + $0x28] sm:$0xff]  ;;  %v69_v20 = vld [vmem:[#allocation2 + $0x58] sm:$0xff]  ;;  %v2192_v23 = vcombine.high %v68_v16, %v72_v17  ;;  %v2191_v30 = vcombine.low %v68_v16, %v72_v17 }
  0x20   :  { %v2180_v11 = vcombine.high %v58_v7, %v62_v8  ;;  %212 = vmatprep.subr.bf16.mxu0 %v2188_v4  ;;  %v2182_v14 = vcombine.high %v59_v12, %v63_v13  ;;  %v55_v15 = vld [vmem:[%s2969_s0] sm:$0xff]  ;;  %255 = vmatprep.subr.bf16.mxu1 %v2190_v9  ;;  %v2179_v18 = vcombine.low %v58_v7, %v62_v8  ;;  %v56_v19 = vld [vmem:[%s2969_s0 + $0x8] sm:$0xff]  ;;  %v73_v21 = vld [vmem:[#allocation2 + $0x78] sm:$0xff] }
  0x21   :  { %213 = vmatpush1.bf16.msra.mxu0 %v2187_v6  ;;  %256 = vmatpush1.bf16.msra.mxu1 %v2189_v10  ;;  %v2181_v22 = vcombine.low %v59_v12, %v63_v13  ;;  %v60_v24 = vld [vmem:[#allocation2 + $0x10] sm:$0xff]  ;;  %v2194_v26 = vcombine.high %v69_v20, %v73_v21  ;;  %v61_v27 = vld [vmem:[#allocation2 + $0x18] sm:$0xff]  ;;  %v57_v28 = vpack.c.bf16 %v56_v19, %v55_v15  ;;  %v2508_v50 = vld [vmem:[#allocation4 + $0x60] ss:$12 sps:$4 sm:$0xff]  }
  0x22   :  { %214 = vmatprep.subr.bf16.mxu0 %v2180_v11  ;;  %v64_v25 = vld [vmem:[#allocation2 + $0x30] sm:$0xff]  ;;  %257 = vmatprep.subr.bf16.mxu1 %v2182_v14  ;;  %v65_v29 = vld [vmem:[#allocation2 + $0x38] sm:$0xff]  ;;  %v2193_v31 = vcombine.low %v69_v20, %v73_v21  ;;  %v2511_v51 = vld [vmem:[#allocation4 + $0x1e0] ss:$12 sps:$4 sm:$0xff]  }
  0x23   :  { %v2184_v32 = vcombine.high %v60_v24, %v64_v25  ;;  %v2186_v33 = vcombine.high %v61_v27, %v65_v29  ;;  %v2183_v34 = vcombine.low %v60_v24, %v64_v25  ;;  %v2185_v35 = vcombine.low %v61_v27, %v65_v29  ;;  %v2492_v36 = vld [vmem:[#allocation4 + $0xac] ss:$12 sps:$4 sm:$0xff]   ;;  %v2490_v38 = vld [vmem:[#allocation4 + $0xa8] ss:$12 sps:$4 sm:$0xff]   ;;  %v2496_v42 = vld [vmem:[#allocation4 + $0x90] ss:$12 sps:$4 sm:$0xff]  }
  0x24   :  { %v2495_v37 = vld [vmem:[#allocation4 + $0x22c] ss:$12 sps:$4 sm:$0xff]   ;;  %v2493_v39 = vld [vmem:[#allocation4 + $0x228] ss:$12 sps:$4 sm:$0xff]   ;;  %v2499_v43 = vld [vmem:[#allocation4 + $0x210] ss:$12 sps:$4 sm:$0xff]  }
  0x25   :  { %215 = vmatpush1.bf16.msra.mxu0 %v2179_v18  ;;  %258 = vmatpush1.bf16.msra.mxu1 %v2181_v22  ;;  %v2498_v40 = vld [vmem:[#allocation4 + $0x94] ss:$12 sps:$4 sm:$0xff]   ;;  %v2504_v44 = vld [vmem:[#allocation4 + $0x7c] ss:$12 sps:$4 sm:$0xff]   ;;  %v2502_v46 = vld [vmem:[#allocation4 + $0x78] ss:$12 sps:$4 sm:$0xff]  }
  0x26   :  { %298 = vmatprep.subr.bf16.mxu0 %v2192_v23  ;;  %341 = vmatprep.subr.bf16.mxu1 %v2194_v26  ;;  %v2501_v41 = vld [vmem:[#allocation4 + $0x214] ss:$12 sps:$4 sm:$0xff]   ;;  %v2507_v45 = vld [vmem:[#allocation4 + $0x1fc] ss:$12 sps:$4 sm:$0xff]   ;;  %v2505_v47 = vld [vmem:[#allocation4 + $0x1f8] ss:$12 sps:$4 sm:$0xff]  }
  0x27   :  { %v2510_v48 = vld [vmem:[#allocation4 + $0x64] ss:$12 sps:$4 sm:$0xff]   ;;  %v2516_v52 = vld [vmem:[#allocation4 + $0x4c] ss:$12 sps:$4 sm:$0xff]   ;;  %v2514_v54 = vld [vmem:[#allocation4 + $0x48] ss:$12 sps:$4 sm:$0xff]  }
  0x28   :  { %2195 = vmatmul.mubr.msk.bf16.vlgmr.msra.gmra.mxu0 %vm196_vm0, %v57_v28  ;;  %2196 = vmatmul.mubr.msk.bf16.vlgmr.msra.gmra.mxu1 %vm196_vm0, %v57_v28  ;;  %v2513_v49 = vld [vmem:[#allocation4 + $0x1e4] ss:$12 sps:$4 sm:$0xff]   ;;  %v2519_v53 = vld [vmem:[#allocation4 + $0x1cc] ss:$12 sps:$4 sm:$0xff]   ;;  %v2517_v55 = vld [vmem:[#allocation4 + $0x1c8] ss:$12 sps:$4 sm:$0xff]  }
  0x29   :  { %299 = vmatpush1.bf16.msra.mxu0 %v2191_v30  ;;  %342 = vmatpush1.bf16.msra.mxu1 %v2193_v31  ;;  %v2522_v56 = vld [vmem:[#allocation4 + $0x34] ss:$12 sps:$4 sm:$0xff]   ;;  %v2520_v58 = vld [vmem:[#allocation4 + $0x30] ss:$12 sps:$4 sm:$0xff]   ;;  %v2526_v62 = vld [vmem:[#allocation4 + $0x18] ss:$12 sps:$4 sm:$0xff]  }
  0x2a   :  { %300 = vmatprep.subr.bf16.mxu0 %v2184_v32  ;;  %343 = vmatprep.subr.bf16.mxu1 %v2186_v33  ;;  %v2525_v57 = vld [vmem:[#allocation4 + $0x1b4] ss:$12 sps:$4 sm:$0xff]   ;;  %v2523_v59 = vld [vmem:[#allocation4 + $0x1b0] ss:$12 sps:$4 sm:$0xff]   ;;  %v2529_v63 = vld [vmem:[#allocation4 + $0x198] ss:$12 sps:$4 sm:$0xff]  }
  0x2b   :  { %318 = vmatprep.mubr.bf16.mxu0 %v2796_v0  ;;  %361 = vmatprep.mubr.bf16.mxu1 %v2796_v0  ;;  %v2528_v60 = vld [vmem:[#allocation4 + $0x1c] ss:$12 sps:$4 sm:$0xff]   ;;  %v2534_v0 = vld [vmem:[#allocation4 + $0x4] ss:$12 sps:$4 sm:$0xff]   ;;  %v2532_v2 = vld [vmem:[#allocation4] ss:$12 sps:$4 sm:$0xff]  }
  0x2c   :  { %v2531_v61 = vld [vmem:[#allocation4 + $0x19c] ss:$12 sps:$4 sm:$0xff]   ;;  %v2537_v1 = vld [vmem:[#allocation4 + $0x184] ss:$12 sps:$4 sm:$0xff]   ;;  %v2535_v3 = vld [vmem:[#allocation4 + $0x180] ss:$12 sps:$4 sm:$0xff]  }
  0x2d   :  { %301 = vmatpush1.bf16.msra.mxu0 %v2183_v34  ;;  %344 = vmatpush1.bf16.msra.mxu1 %v2185_v35  ;;  %v2540_v4 = vld [vmem:[#allocation4 + $0x16c] ss:$12 sps:$4 sm:$0xff]   ;;  %v2538_v6 = vld [vmem:[#allocation4 + $0x168] ss:$12 sps:$4 sm:$0xff]   ;;  %v2544_v10 = vld [vmem:[#allocation4 + $0x150] ss:$12 sps:$4 sm:$0xff]  }
  0x2e   :  { %1053 = vmatprep.subr.bf16.mxu0 %v2492_v36  ;;  %1096 = vmatprep.subr.bf16.mxu1 %v2495_v37  ;;  %v2543_v5 = vld [vmem:[#allocation4 + $0x2ec] ss:$12 sps:$4 sm:$0xff]   ;;  %v2541_v7 = vld [vmem:[#allocation4 + $0x2e8] ss:$12 sps:$4 sm:$0xff]   ;;  %v2547_v11 = vld [vmem:[#allocation4 + $0x2d0] ss:$12 sps:$4 sm:$0xff]  }
  0x2f   :  { %v2546_v8 = vld [vmem:[#allocation4 + $0x154] ss:$12 sps:$4 sm:$0xff]   ;;  %v2552_v12 = vld [vmem:[#allocation4 + $0x13c] ss:$12 sps:$4 sm:$0xff]   ;;  %v2550_v14 = vld [vmem:[#allocation4 + $0x138] ss:$12 sps:$4 sm:$0xff]  }
  0x30   :  { %2197 = vmatmul.mubr.msk.bf16.vlgmr.msra.gmra.mxu0 %vm196_vm0, %v57_v28  ;;  %2198 = vmatmul.mubr.msk.bf16.vlgmr.msra.gmra.mxu1 %vm196_vm0, %v57_v28  ;;  %v2549_v9 = vld [vmem:[#allocation4 + $0x2d4] ss:$12 sps:$4 sm:$0xff]   ;;  %v2555_v13 = vld [vmem:[#allocation4 + $0x2bc] ss:$12 sps:$4 sm:$0xff]   ;;  %v2553_v15 = vld [vmem:[#allocation4 + $0x2b8] ss:$12 sps:$4 sm:$0xff]  }
  0x31   :  { %1054 = vmatpush1.bf16.msra.mxu0 %v2490_v38  ;;  %1097 = vmatpush1.bf16.msra.mxu1 %v2493_v39  ;;  %v2558_v16 = vld [vmem:[#allocation4 + $0x124] ss:$12 sps:$4 sm:$0xff]   ;;  %v2556_v18 = vld [vmem:[#allocation4 + $0x120] ss:$12 sps:$4 sm:$0xff]   ;;  %v2562_v22 = vld [vmem:[#allocation4 + $0x108] ss:$12 sps:$4 sm:$0xff]   ;;  %v76_v38 = vlaneseq }
  0x32   :  { %1055 = vmatprep.subr.bf16.mxu0 %v2498_v40  ;;  %1098 = vmatprep.subr.bf16.mxu1 %v2501_v41  ;;  %v2561_v17 = vld [vmem:[#allocation4 + $0x2a4] ss:$12 sps:$4 sm:$0xff]   ;;  %v2559_v19 = vld [vmem:[#allocation4 + $0x2a0] ss:$12 sps:$4 sm:$0xff]   ;;  %v2565_v23 = vld [vmem:[#allocation4 + $0x288] ss:$12 sps:$4 sm:$0xff]  }
  0x33   :  { %v2564_v20 = vld [vmem:[#allocation4 + $0x10c] ss:$12 sps:$4 sm:$0xff]   ;;  %v2570_v24 = vld [vmem:[#allocation4 + $0xf4] ss:$12 sps:$4 sm:$0xff]   ;;  %v2568_v26 = vld [vmem:[#allocation4 + $0xf0] ss:$12 sps:$4 sm:$0xff]  }
  0x34   :  { %v2567_v21 = vld [vmem:[#allocation4 + $0x28c] ss:$12 sps:$4 sm:$0xff]   ;;  %v2573_v25 = vld [vmem:[#allocation4 + $0x274] ss:$12 sps:$4 sm:$0xff]   ;;  %v2571_v27 = vld [vmem:[#allocation4 + $0x270] ss:$12 sps:$4 sm:$0xff]  }
  0x35   :  { %1056 = vmatpush1.bf16.msra.mxu0 %v2496_v42  ;;  %1099 = vmatpush1.bf16.msra.mxu1 %v2499_v43  ;;  %v2576_v28 = vld [vmem:[#allocation4 + $0xdc] ss:$12 sps:$4 sm:$0xff]   ;;  %v2574_v30 = vld [vmem:[#allocation4 + $0xd8] ss:$12 sps:$4 sm:$0xff]   ;;  %v2580_v34 = vld [vmem:[#allocation4 + $0xc0] ss:$12 sps:$4 sm:$0xff]  }
  0x36   :  { %1057 = vmatprep.subr.bf16.mxu0 %v2504_v44  ;;  %1100 = vmatprep.subr.bf16.mxu1 %v2507_v45  ;;  %v2579_v29 = vld [vmem:[#allocation4 + $0x25c] ss:$12 sps:$4 sm:$0xff]   ;;  %v2577_v31 = vld [vmem:[#allocation4 + $0x258] ss:$12 sps:$4 sm:$0xff]   ;;  %v2583_v35 = vld [vmem:[#allocation4 + $0x240] ss:$12 sps:$4 sm:$0xff]  }
  0x37   :  { %v2582_v32 = vld [vmem:[#allocation4 + $0xc4] ss:$12 sps:$4 sm:$0xff]   ;;  %v2853_v39 = vshrl.u32 %v76_v38, 7 }
  0x38   :  { %v2585_v33 = vld [vmem:[#allocation4 + $0x244] ss:$12 sps:$4 sm:$0xff]  }
  0x39   :  { %1058 = vmatpush1.bf16.msra.mxu0 %v2502_v46  ;;  %1101 = vmatpush1.bf16.msra.mxu1 %v2505_v47  ;;  %v2586_v36 = vld [vmem:[#allocation4 + $0x170] ss:$12 sps:$4 sm:$0xff]   ;;  %v2856_v40 = vsub.s32 1, %v2853_v39  ;;  %v2859_v41 = vsub.s32 0, %v2853_v39  ;;  %v90_v42 = vsub.s32 3, %v2853_v39  ;;  %v2865_v43 = vld [vmem:[%s2971_s2] sm:$0xff] }
  0x3a   :  { %1059 = vmatprep.subr.bf16.mxu0 %v2510_v48  ;;  %1102 = vmatprep.subr.bf16.mxu1 %v2513_v49  ;;  %v2587_v37 = vld [vmem:[#allocation4 + $0x2f0] ss:$12 sps:$4 sm:$0xff]   ;;  %v2868_v44 = vsub.s32 2, %v2853_v39 }
  0x3b   :  { %v83_v47 = vrot.slane %v2865_v43, %v2856_v40  ;;  %v79_v48 = vrot.slane %v2865_v43, %v2859_v41 }
  0x3d   :  { %1060 = vmatpush1.bf16.msra.mxu0 %v2508_v50  ;;  %1103 = vmatpush1.bf16.msra.mxu1 %v2511_v51  ;;  %v91_v50 = vrot.slane %v2865_v43, %v90_v42  ;;  %v87_v51 = vrot.slane %v2865_v43, %v2868_v44  ;;  %v106_v42 = vsub.s32 7, %v2853_v39 }
  0x3e   :  { %1061 = vmatprep.subr.bf16.mxu0 %v2516_v52  ;;  %1104 = vmatprep.subr.bf16.mxu1 %v2519_v53 }
  0x41   :  { %1062 = vmatpush1.bf16.msra.mxu0 %v2514_v54  ;;  %1105 = vmatpush1.bf16.msra.mxu1 %v2517_v55 }
  0x42   :  { %1063 = vmatprep.subr.bf16.mxu0 %v2522_v56  ;;  %1106 = vmatprep.subr.bf16.mxu1 %v2525_v57 }
  0x45   :  { %1064 = vmatpush1.bf16.msra.mxu0 %v2520_v58  ;;  %1107 = vmatpush1.bf16.msra.mxu1 %v2523_v59 }
  0x46   :  { %1065 = vmatprep.subr.bf16.mxu0 %v2528_v60  ;;  %1108 = vmatprep.subr.bf16.mxu1 %v2531_v61 }
  0x49   :  { %1066 = vmatpush1.bf16.msra.mxu0 %v2526_v62  ;;  %1109 = vmatpush1.bf16.msra.mxu1 %v2529_v63 }
  0x4a   :  { %1067 = vmatprep.subr.bf16.mxu0 %v2534_v0  ;;  %1110 = vmatprep.subr.bf16.mxu1 %v2537_v1 }
  0x4d   :  { %1068 = vmatpush1.bf16.msra.mxu0 %v2532_v2  ;;  %1111 = vmatpush1.bf16.msra.mxu1 %v2535_v3 }
  0x4e   :  { %1069 = vmatprep.subr.bf16.mxu0 %v2540_v4  ;;  %1112 = vmatprep.subr.bf16.mxu1 %v2543_v5 }
  0x51   :  { %1070 = vmatpush2.bf16.msra.mxu0 %v2538_v6  ;;  %1113 = vmatpush2.bf16.msra.mxu1 %v2541_v7 }
  0x52   :  { %1071 = vmatprep.subr.bf16.mxu0 %v2546_v8  ;;  %1114 = vmatprep.subr.bf16.mxu1 %v2549_v9 }
  0x55   :  { %1072 = vmatpush2.bf16.msra.mxu0 %v2544_v10  ;;  %1115 = vmatpush2.bf16.msra.mxu1 %v2547_v11  ;;  %v2588_v10 = vld [vmem:[#allocation4 + $0xb0] ss:$12 sps:$4 sm:$0xff]  }
  0x56   :  { %1073 = vmatprep.subr.bf16.mxu0 %v2552_v12  ;;  %1116 = vmatprep.subr.bf16.mxu1 %v2555_v13  ;;  %v2589_v13 = vld [vmem:[#allocation4 + $0x230] ss:$12 sps:$4 sm:$0xff]  }
  0x59   :  { %1074 = vmatpush2.bf16.msra.mxu0 %v2550_v14  ;;  %1117 = vmatpush2.bf16.msra.mxu1 %v2553_v15  ;;  %v2590_v15 = vld [vmem:[#allocation4 + $0x158] ss:$12 sps:$4 sm:$0xff]  }
  0x5a   :  { %1075 = vmatprep.subr.bf16.mxu0 %v2558_v16  ;;  %1118 = vmatprep.subr.bf16.mxu1 %v2561_v17  ;;  %v2591_v16 = vld [vmem:[#allocation4 + $0x2d8] ss:$12 sps:$4 sm:$0xff]  }
  0x5b   :  { %v2592_v17 = vld [vmem:[#allocation4 + $0x98] ss:$12 sps:$4 sm:$0xff]  }
  0x5d   :  { %1076 = vmatpush2.bf16.msra.mxu0 %v2556_v18  ;;  %1119 = vmatpush2.bf16.msra.mxu1 %v2559_v19  ;;  %v2593_v18 = vld [vmem:[#allocation4 + $0x218] ss:$12 sps:$4 sm:$0xff]   ;;  %v2594_v19 = vld [vmem:[#allocation4 + $0x140] ss:$12 sps:$4 sm:$0xff]  }
  0x5e   :  { %1077 = vmatprep.subr.bf16.mxu0 %v2564_v20  ;;  %1120 = vmatprep.subr.bf16.mxu1 %v2567_v21  ;;  %v2595_v20 = vld [vmem:[#allocation4 + $0x2c0] ss:$12 sps:$4 sm:$0xff]  }
  0x5f   :  { %v2596_v21 = vld [vmem:[#allocation4 + $0x80] ss:$12 sps:$4 sm:$0xff]  }
  0x61   :  { %1078 = vmatpush2.bf16.msra.mxu0 %v2562_v22  ;;  %1121 = vmatpush2.bf16.msra.mxu1 %v2565_v23  ;;  %v2597_v22 = vld [vmem:[#allocation4 + $0x200] ss:$12 sps:$4 sm:$0xff]   ;;  %v2598_v23 = vld [vmem:[#allocation4 + $0x128] ss:$12 sps:$4 sm:$0xff]  }
  0x62   :  { %1079 = vmatprep.subr.bf16.mxu0 %v2570_v24  ;;  %1122 = vmatprep.subr.bf16.mxu1 %v2573_v25  ;;  %v2599_v24 = vld [vmem:[#allocation4 + $0x2a8] ss:$12 sps:$4 sm:$0xff]  }
  0x65   :  { %1080 = vmatpush2.bf16.msra.mxu0 %v2568_v26  ;;  %1123 = vmatpush2.bf16.msra.mxu1 %v2571_v27  ;;  %v2600_v26 = vld [vmem:[#allocation4 + $0x68] ss:$12 sps:$4 sm:$0xff]  }
  0x66   :  { %1081 = vmatprep.subr.bf16.mxu0 %v2576_v28  ;;  %1124 = vmatprep.subr.bf16.mxu1 %v2579_v29  ;;  %v2601_v28 = vld [vmem:[#allocation4 + $0x1e8] ss:$12 sps:$4 sm:$0xff]   ;;  %v2602_v29 = vld [vmem:[#allocation4 + $0x110] ss:$12 sps:$4 sm:$0xff]  }
  0x69   :  { %1082 = vmatpush2.bf16.msra.mxu0 %v2574_v30  ;;  %1125 = vmatpush2.bf16.msra.mxu1 %v2577_v31  ;;  %v2603_v30 = vld [vmem:[#allocation4 + $0x290] ss:$12 sps:$4 sm:$0xff]  }
  0x6a   :  { %1083 = vmatprep.subr.bf16.mxu0 %v2582_v32  ;;  %1126 = vmatprep.subr.bf16.mxu1 %v2585_v33  ;;  %v2604_v32 = vld [vmem:[#allocation4 + $0x50] ss:$12 sps:$4 sm:$0xff]  }
  0x6d   :  { %1084 = vmatpush2.bf16.msra.mxu0 %v2580_v34  ;;  %1127 = vmatpush2.bf16.msra.mxu1 %v2583_v35  ;;  %v2605_v34 = vld [vmem:[#allocation4 + $0x1d0] ss:$12 sps:$4 sm:$0xff]   ;;  %v2606_v35 = vld [vmem:[#allocation4 + $0xf8] ss:$12 sps:$4 sm:$0xff]  }
  0x6e   :  { %2395 = vmatprep.subr.bf16.mxu0 %v2586_v36  ;;  %2417 = vmatprep.subr.bf16.mxu1 %v2587_v37  ;;  %v2607_v36 = vld [vmem:[#allocation4 + $0x278] ss:$12 sps:$4 sm:$0xff]   ;;  %v98_v37 = vsub.s32 5, %v2853_v39 }
  0xe8   :  { %v234_v45 = vpop.f32.mrf.mxu0  ;;  %v277_v46 = vpop.f32.mrf.mxu1 }
  0xe9   :  { %v235_v57 = vadd.f32 %v234_v45, %v79_v48  ;;  %v278_v61 = vadd.f32 %v277_v46, %v87_v51  ;;  %v2608_v45 = vld [vmem:[#allocation4 + $0x38] ss:$12 sps:$4 sm:$0xff]  }
  0xea   :  { %v236_v49 = vpop.f32.mrf.mxu0  ;;  %v279_v52 = vpop.f32.mrf.mxu1 }
  0xeb   :  { %v237_v54 = vadd.f32 %v236_v49, %v83_v47  ;;  %v280_v58 = vadd.f32 %v279_v52, %v91_v50  ;;  %v372_v5 = vmax.f32 %v235_v57, 0.0  ;;  %v374_v8 = vmax.f32 %v278_v61, 0.0  ;;  %v2611_v49 = vld [vmem:[#allocation4 + $0x260] ss:$12 sps:$4 sm:$0xff]   ;;  %v2615_v57 = vld [vmem:[#allocation4 + $0x248] ss:$12 sps:$4 sm:$0xff]  }
  0xec   :  { %v238_v53 = vpop.f32.mrf.mxu0  ;;  %v281_v56 = vpop.f32.mrf.mxu1 }
  0xed   :  { %v239_v55 = vadd.f32 %v238_v53, %v79_v48  ;;  %v282_v59 = vadd.f32 %v281_v56, %v87_v51  ;;  %v373_v2 = vmax.f32 %v237_v54, 0.0  ;;  %v375_v6 = vmax.f32 %v280_v58, 0.0  ;;  %v2610_v48 = vld [vmem:[#allocation4 + $0xe0] ss:$12 sps:$4 sm:$0xff]   ;;  %v2614_v56 = vld [vmem:[#allocation4 + $0xc8] ss:$12 sps:$4 sm:$0xff]  }
  0xee   :  { %v240_v60 = vpop.f32.mrf.mxu0  ;;  %v283_v63 = vpop.f32.mrf.mxu1  ;;  %v107_v51 = vrot.slane %v2865_v43, %v106_v42  ;;  %v2612_v53 = vld [vmem:[#allocation4 + $0x20] ss:$12 sps:$4 sm:$0xff]  }
  0xef   :  { %v241_v62 = vadd.f32 %v240_v60, %v83_v47  ;;  %v380_v0 = vmax.f32 %v239_v55, 0.0  ;;  %v284_v1 = vadd.f32 %v283_v63, %v91_v50  ;;  %v382_v3 = vmax.f32 %v282_v59, 0.0  ;;  %v2609_v47 = vld [vmem:[#allocation4 + $0x1b8] ss:$12 sps:$4 sm:$0xff]   ;;  %v2613_v55 = vld [vmem:[#allocation4 + $0x1a0] ss:$12 sps:$4 sm:$0xff]  }
  0xf0   :  { %v2883_v25 = vpop.f32.mrf.mxu0  ;;  %v2885_v27 = vpop.f32.mrf.mxu1  ;;  %v99_v50 = vrot.slane %v2865_v43, %v98_v37  ;;  %v2617_v63 = vld [vmem:[#allocation4 + $0x188] ss:$12 sps:$4 sm:$0xff]   ;;  %v2665_v37 = vld [vmem:[#allocation4 + $0x484] ss:$12 sps:$4 sm:$0xff]   ;;  %v2660_v42 = vld [vmem:[#allocation4 + $0x300] ss:$12 sps:$4 sm:$0xff]  }
  0xf1   :  { %v381_v4 = vmax.f32 %v241_v62, 0.0  ;;  %v383_v7 = vmax.f32 %v284_v1, 0.0  ;;  %v2877_v11 = vpack.c.bf16 %v380_v0, %v372_v5  ;;  %v2879_v14 = vpack.c.bf16 %v382_v3, %v374_v8  ;;  %v2616_v62 = vld [vmem:[#allocation4 + $0x8] ss:$12 sps:$4 sm:$0xff]   ;;  %v2620_v0 = vld [vmem:[#allocation4 + $0x3ac] ss:$12 sps:$4 sm:$0xff]  }
  0xf2   :  { %v322_v31 = vpop.f32.mrf.mxu0  ;;  %v365_v33 = vpop.f32.mrf.mxu1  ;;  %v2623_v1 = vld [vmem:[#allocation4 + $0x52c] ss:$12 sps:$4 sm:$0xff]   ;;  %v2626_v8 = vld [vmem:[#allocation4 + $0x394] ss:$12 sps:$4 sm:$0xff]  }
  0xf3   :  { %v389_v9 = vpack.c.bf16 %v381_v4, %v373_v2  ;;  %v391_v12 = vpack.c.bf16 %v383_v7, %v375_v6  ;;  %v323_v58 = vadd.f32 %v322_v31, %v99_v50  ;;  %v366_v60 = vadd.f32 %v365_v33, %v107_v51  ;;  %v2618_v6 = vld [vmem:[#allocation4 + $0x3a8] ss:$12 sps:$4 sm:$0xff]   ;;  %v2651_v31 = vld [vmem:[#allocation4 + $0x4b0] ss:$12 sps:$4 sm:$0xff]  }
  0xf4   :  { %v2888_v38 = vpop.f32.mrf.mxu0  ;;  %v2891_v46 = vpop.f32.mrf.mxu1  ;;  %v2621_v7 = vld [vmem:[#allocation4 + $0x528] ss:$12 sps:$4 sm:$0xff]  }
  0xf5   :  { %1085 = vmatprep.mubr.bf16.mxu0 %v389_v9  ;;  %1128 = vmatprep.mubr.bf16.mxu1 %v391_v12  ;;  %v377_v2 = vmax.f32 %v323_v58, 0.0  ;;  %v379_v4 = vmax.f32 %v366_v60, 0.0  ;;  %v2659_v33 = vld [vmem:[#allocation4 + $0x49c] ss:$12 sps:$4 sm:$0xff]   ;;  %v2681_v58 = vld [vmem:[#allocation4 + $0x5b8] ss:$12 sps:$4 sm:$0xff]  }
  0xf6   :  { %1086 = vmatmul.mubr.bf16.vlgmr.msra.gmra.mxu0 %v2877_v11  ;;  %1129 = vmatmul.mubr.bf16.vlgmr.msra.gmra.mxu1 %v2879_v14  ;;  %v326_v52 = vpop.f32.mrf.mxu0  ;;  %v369_v54 = vpop.f32.mrf.mxu1  ;;  %v2689_v60 = vld [vmem:[#allocation4 + $0x5a4] ss:$12 sps:$4 sm:$0xff]  }
  0xf7   :  { %2396 = vmatpush3.bf16.msra.mxu0 %v2588_v10  ;;  %2418 = vmatpush3.bf16.msra.mxu1 %v2589_v13  ;;  %v327_v59 = vadd.f32 %v326_v52, %v99_v50  ;;  %v370_v61 = vadd.f32 %v369_v54, %v107_v51  ;;  %v2624_v13 = vld [vmem:[#allocation4 + $0x390] ss:$12 sps:$4 sm:$0xff]   ;;  %v2669_v50 = vld [vmem:[#allocation4 + $0x5e8] ss:$12 sps:$4 sm:$0xff]  }
  0xf8   :  { %1171 = vmatprep.mubr.bf16.mxu0 %v389_v9  ;;  %1212 = vmatprep.mubr.bf16.mxu1 %v391_v12  ;;  %v2629_v9 = vld [vmem:[#allocation4 + $0x514] ss:$12 sps:$4 sm:$0xff]   ;;  %v2675_v54 = vld [vmem:[#allocation4 + $0x5d0] ss:$12 sps:$4 sm:$0xff]  }
  0xf9   :  { %2397 = vmatprep.subr.bf16.mxu0 %v2590_v15  ;;  %2419 = vmatprep.subr.bf16.mxu1 %v2591_v16  ;;  %v385_v3 = vmax.f32 %v327_v59, 0.0  ;;  %v387_v5 = vmax.f32 %v370_v61, 0.0  ;;  %v2627_v15 = vld [vmem:[#allocation4 + $0x510] ss:$12 sps:$4 sm:$0xff]   ;;  %v2674_v51 = vld [vmem:[#allocation4 + $0x454] ss:$12 sps:$4 sm:$0xff]  }
  0xfa   :  { %v2632_v16 = vld [vmem:[#allocation4 + $0x37c] ss:$12 sps:$4 sm:$0xff]   ;;  %v2677_v52 = vld [vmem:[#allocation4 + $0x5d4] ss:$12 sps:$4 sm:$0xff]   ;;  %v2686_v59 = vld [vmem:[#allocation4 + $0x424] ss:$12 sps:$4 sm:$0xff]  }
  0xfb   :  { %2398 = vmatpush3.bf16.msra.mxu0 %v2592_v17  ;;  %2420 = vmatpush3.bf16.msra.mxu1 %v2593_v18  ;;  %v2895_v10 = vpack.c.bf16 %v385_v3, %v377_v2  ;;  %v2898_v12 = vpack.c.bf16 %v387_v5, %v379_v4  ;;  %v2635_v17 = vld [vmem:[#allocation4 + $0x4fc] ss:$12 sps:$4 sm:$0xff]   ;;  %v2630_v18 = vld [vmem:[#allocation4 + $0x378] ss:$12 sps:$4 sm:$0xff]   ;;  %v2684_v61 = vld [vmem:[#allocation4 + $0x420] ss:$12 sps:$4 sm:$0xff]  }
  0xfc   :  { %2399 = vmatprep.subr.bf16.mxu0 %v2594_v19  ;;  %2421 = vmatprep.subr.bf16.mxu1 %v2595_v20  ;;  %v2638_v19 = vld [vmem:[#allocation4 + $0x364] ss:$12 sps:$4 sm:$0xff]   ;;  %v2636_v20 = vld [vmem:[#allocation4 + $0x360] ss:$12 sps:$4 sm:$0xff]   ;;  %v2904_v2 = vsub.s32 4, %v2853_v39  ;;  %v102_v5 = vsub.s32 6, %v2853_v39 }
  0xfd   :  { %v2693_v3 = vld [vmem:[#allocation4 + $0x588] ss:$12 sps:$4 sm:$0xff]  }
  0xfe   :  { %v2698_v4 = vld [vmem:[#allocation4 + $0x3f4] ss:$12 sps:$4 sm:$0xff]  }
  0xff   :  { %2400 = vmatpush3.bf16.msra.mxu0 %v2596_v21  ;;  %2422 = vmatpush3.bf16.msra.mxu1 %v2597_v22  ;;  %v2639_v21 = vld [vmem:[#allocation4 + $0x4e0] ss:$12 sps:$4 sm:$0xff]  }
 0x100   :  { %2401 = vmatprep.subr.bf16.mxu0 %v2598_v23  ;;  %2423 = vmatprep.subr.bf16.mxu1 %v2599_v24  ;;  %v2644_v22 = vld [vmem:[#allocation4 + $0x34c] ss:$12 sps:$4 sm:$0xff]   ;;  %v2642_v24 = vld [vmem:[#allocation4 + $0x348] ss:$12 sps:$4 sm:$0xff]  }
 0x101   :  { %v2647_v23 = vld [vmem:[#allocation4 + $0x4cc] ss:$12 sps:$4 sm:$0xff]  }
 0x103   :  { %2402 = vmatpush3.bf16.msra.mxu0 %v2600_v26  ;;  %2424 = vmatpush3.bf16.msra.mxu1 %v2601_v28  ;;  %v2645_v26 = vld [vmem:[#allocation4 + $0x4c8] ss:$12 sps:$4 sm:$0xff]  }
 0x104   :  { %2403 = vmatprep.subr.bf16.mxu0 %v2602_v29  ;;  %2425 = vmatprep.subr.bf16.mxu1 %v2603_v30  ;;  %v2650_v28 = vld [vmem:[#allocation4 + $0x334] ss:$12 sps:$4 sm:$0xff]   ;;  %v2648_v30 = vld [vmem:[#allocation4 + $0x330] ss:$12 sps:$4 sm:$0xff]  }
 0x105   :  { %v2653_v29 = vld [vmem:[#allocation4 + $0x4b4] ss:$12 sps:$4 sm:$0xff]  }
 0x107   :  { %2404 = vmatpush3.bf16.msra.mxu0 %v2604_v32  ;;  %2426 = vmatpush3.bf16.msra.mxu1 %v2605_v34  ;;  %v2656_v32 = vld [vmem:[#allocation4 + $0x31c] ss:$12 sps:$4 sm:$0xff]   ;;  %v2654_v34 = vld [vmem:[#allocation4 + $0x318] ss:$12 sps:$4 sm:$0xff]  }
 0x108   :  { %2405 = vmatprep.subr.bf16.mxu0 %v2606_v35  ;;  %2427 = vmatprep.subr.bf16.mxu1 %v2607_v36  ;;  %v2657_v35 = vld [vmem:[#allocation4 + $0x498] ss:$12 sps:$4 sm:$0xff]  }
 0x109   :  { %v2662_v36 = vld [vmem:[#allocation4 + $0x304] ss:$12 sps:$4 sm:$0xff]  }
 0x10b   :  { %2406 = vmatpush3.bf16.msra.mxu0 %v2608_v45  ;;  %2428 = vmatpush3.bf16.msra.mxu1 %v2609_v47  ;;  %v2663_v45 = vld [vmem:[#allocation4 + $0x480] ss:$12 sps:$4 sm:$0xff]  }
 0x10c   :  { %2407 = vmatprep.subr.bf16.mxu0 %v2610_v48  ;;  %2429 = vmatprep.subr.bf16.mxu1 %v2611_v49  ;;  %v2668_v47 = vld [vmem:[#allocation4 + $0x46c] ss:$12 sps:$4 sm:$0xff]   ;;  %v2666_v49 = vld [vmem:[#allocation4 + $0x468] ss:$12 sps:$4 sm:$0xff]  }
 0x10d   :  { %v2671_v48 = vld [vmem:[#allocation4 + $0x5ec] ss:$12 sps:$4 sm:$0xff]  }
 0x10f   :  { %2408 = vmatpush3.bf16.msra.mxu0 %v2612_v53  ;;  %2430 = vmatpush3.bf16.msra.mxu1 %v2613_v55  ;;  %v2672_v53 = vld [vmem:[#allocation4 + $0x450] ss:$12 sps:$4 sm:$0xff]  }
 0x110   :  { %2409 = vmatprep.subr.bf16.mxu0 %v2614_v56  ;;  %2431 = vmatprep.subr.bf16.mxu1 %v2615_v57  ;;  %v2680_v55 = vld [vmem:[#allocation4 + $0x43c] ss:$12 sps:$4 sm:$0xff]   ;;  %v2678_v57 = vld [vmem:[#allocation4 + $0x438] ss:$12 sps:$4 sm:$0xff]  }
 0x111   :  { %v2683_v56 = vld [vmem:[#allocation4 + $0x5bc] ss:$12 sps:$4 sm:$0xff]  }
 0x113   :  { %2410 = vmatpush3.bf16.msra.mxu0 %v2616_v62  ;;  %2432 = vmatpush3.bf16.msra.mxu1 %v2617_v63  ;;  %v2687_v62 = vld [vmem:[#allocation4 + $0x5a0] ss:$12 sps:$4 sm:$0xff]  }
 0x114   :  { %1942 = vmatprep.subr.bf16.mxu0 %v2620_v0  ;;  %1985 = vmatprep.subr.bf16.mxu1 %v2623_v1  ;;  %v2692_v63 = vld [vmem:[#allocation4 + $0x40c] ss:$12 sps:$4 sm:$0xff]   ;;  %v2690_v1 = vld [vmem:[#allocation4 + $0x408] ss:$12 sps:$4 sm:$0xff]  }
 0x115   :  { %v2695_v0 = vld [vmem:[#allocation4 + $0x58c] ss:$12 sps:$4 sm:$0xff]  }
 0x116   :  { %1172 = vmatmul.mubr.bf16.vlgmr.msra.gmra.mxu0 %v2877_v11  ;;  %1213 = vmatmul.mubr.bf16.vlgmr.msra.gmra.mxu1 %v2879_v14  ;;  %v2633_v11 = vld [vmem:[#allocation4 + $0x4f8] ss:$12 sps:$4 sm:$0xff]  }
 0x117   :  { %1943 = vmatpush1.bf16.msra.mxu0 %v2618_v6  ;;  %1986 = vmatpush1.bf16.msra.mxu1 %v2621_v7  ;;  %v2641_v14 = vld [vmem:[#allocation4 + $0x4e4] ss:$12 sps:$4 sm:$0xff]   ;;  %v2701_v6 = vld [vmem:[#allocation4 + $0x574] ss:$12 sps:$4 sm:$0xff]  }
 0x118   :  { %1944 = vmatprep.subr.bf16.mxu0 %v2626_v8  ;;  %1987 = vmatprep.subr.bf16.mxu1 %v2629_v9  ;;  %v2696_v7 = vld [vmem:[#allocation4 + $0x3f0] ss:$12 sps:$4 sm:$0xff]   ;;  %v95_v8 = vrot.slane %v2865_v43, %v2904_v2 }
 0x119   :  { %1974 = vmatprep.mubr.bf16.mxu0 %v2895_v10  ;;  %2017 = vmatprep.mubr.bf16.mxu1 %v2898_v12  ;;  %v2699_v9 = vld [vmem:[#allocation4 + $0x570] ss:$12 sps:$4 sm:$0xff]  }
 0x11a   :  { %v325_v39 = vadd.f32 %v2888_v38, %v95_v8 }
 0x11b   :  { %1945 = vmatpush1.bf16.msra.mxu0 %v2624_v13  ;;  %1988 = vmatpush1.bf16.msra.mxu1 %v2627_v15  ;;  %v2704_v13 = vld [vmem:[#allocation4 + $0x3dc] ss:$12 sps:$4 sm:$0xff]   ;;  %v103_v15 = vrot.slane %v2865_v43, %v102_v5  ;;  %v2708_v43 = vld [vmem:[#allocation4 + $0x3c0] ss:$12 sps:$4 sm:$0xff]  }
 0x11c   :  { %1946 = vmatprep.subr.bf16.mxu0 %v2632_v16  ;;  %1989 = vmatprep.subr.bf16.mxu1 %v2635_v17  ;;  %v2707_v16 = vld [vmem:[#allocation4 + $0x55c] ss:$12 sps:$4 sm:$0xff]   ;;  %v2702_v17 = vld [vmem:[#allocation4 + $0x3d8] ss:$12 sps:$4 sm:$0xff]  }
 0x11f   :  { %1947 = vmatpush1.bf16.msra.mxu0 %v2630_v18  ;;  %1990 = vmatpush1.bf16.msra.mxu1 %v2633_v11  ;;  %v321_v18 = vadd.f32 %v2883_v25, %v95_v8  ;;  %v2705_v11 = vld [vmem:[#allocation4 + $0x558] ss:$12 sps:$4 sm:$0xff]   ;;  %v2714_v25 = vld [vmem:[#allocation4 + $0x470] ss:$12 sps:$4 sm:$0xff]  }
 0x120   :  { %1948 = vmatprep.subr.bf16.mxu0 %v2638_v19  ;;  %1991 = vmatprep.subr.bf16.mxu1 %v2641_v14  ;;  %v2710_v19 = vld [vmem:[#allocation4 + $0x3c4] ss:$12 sps:$4 sm:$0xff]   ;;  %v364_v14 = vadd.f32 %v2885_v27, %v103_v15 }
 0x121   :  { %v2717_v27 = vld [vmem:[#allocation4 + $0x530] ss:$12 sps:$4 sm:$0xff]  }
 0x123   :  { %1949 = vmatpush1.bf16.msra.mxu0 %v2636_v20  ;;  %1992 = vmatpush1.bf16.msra.mxu1 %v2639_v21  ;;  %v368_v20 = vadd.f32 %v2891_v46, %v103_v15  ;;  %v2713_v21 = vld [vmem:[#allocation4 + $0x544] ss:$12 sps:$4 sm:$0xff]  }
 0x124   :  { %1950 = vmatprep.subr.bf16.mxu0 %v2644_v22  ;;  %1993 = vmatprep.subr.bf16.mxu1 %v2647_v23  ;;  %v376_v22 = vmax.f32 %v321_v18, 0.0  ;;  %v384_v23 = vmax.f32 %v325_v39, 0.0 }
 0x125   :  { %v386_v38 = vmax.f32 %v368_v20, 0.0 }
 0x127   :  { %1951 = vmatpush1.bf16.msra.mxu0 %v2642_v24  ;;  %1994 = vmatpush1.bf16.msra.mxu1 %v2645_v26  ;;  %v2711_v24 = vld [vmem:[#allocation4 + $0x540] ss:$12 sps:$4 sm:$0xff]   ;;  %v378_v26 = vmax.f32 %v364_v14, 0.0 }
 0x128   :  { %1952 = vmatprep.subr.bf16.mxu0 %v2650_v28  ;;  %1995 = vmatprep.subr.bf16.mxu1 %v2653_v29  ;;  %v2715_v28 = vld [vmem:[#allocation4 + $0x5f0] ss:$12 sps:$4 sm:$0xff]  }
 0x129   :  { %v2716_v29 = vld [vmem:[#allocation4 + $0x3b0] ss:$12 sps:$4 sm:$0xff]   ;;  %v2916_v46 = vpack.c.bf16 %v386_v38, %v378_v26 }
 0x12b   :  { %1953 = vmatpush1.bf16.msra.mxu0 %v2648_v30  ;;  %1996 = vmatpush1.bf16.msra.mxu1 %v2651_v31  ;;  %v2914_v30 = vpack.c.bf16 %v384_v23, %v376_v22  ;;  %v2718_v31 = vld [vmem:[#allocation4 + $0x458] ss:$12 sps:$4 sm:$0xff]  }
 0x12c   :  { %1954 = vmatprep.subr.bf16.mxu0 %v2656_v32  ;;  %1997 = vmatprep.subr.bf16.mxu1 %v2659_v33  ;;  %v2719_v32 = vld [vmem:[#allocation4 + $0x5d8] ss:$12 sps:$4 sm:$0xff]  }
 0x12d   :  { %v2720_v33 = vld [vmem:[#allocation4 + $0x398] ss:$12 sps:$4 sm:$0xff]  }
 0x12f   :  { %1955 = vmatpush1.bf16.msra.mxu0 %v2654_v34  ;;  %1998 = vmatpush1.bf16.msra.mxu1 %v2657_v35  ;;  %v2721_v34 = vld [vmem:[#allocation4 + $0x518] ss:$12 sps:$4 sm:$0xff]   ;;  %v2722_v35 = vld [vmem:[#allocation4 + $0x440] ss:$12 sps:$4 sm:$0xff]  }
 0x130   :  { %1956 = vmatprep.subr.bf16.mxu0 %v2662_v36  ;;  %1999 = vmatprep.subr.bf16.mxu1 %v2665_v37  ;;  %v2723_v36 = vld [vmem:[#allocation4 + $0x5c0] ss:$12 sps:$4 sm:$0xff]  }
 0x131   :  { %v2724_v37 = vld [vmem:[#allocation4 + $0x380] ss:$12 sps:$4 sm:$0xff]  }
 0x133   :  { %1957 = vmatpush1.bf16.msra.mxu0 %v2660_v42  ;;  %2000 = vmatpush1.bf16.msra.mxu1 %v2663_v45  ;;  %v2725_v42 = vld [vmem:[#allocation4 + $0x500] ss:$12 sps:$4 sm:$0xff]   ;;  %v2726_v45 = vld [vmem:[#allocation4 + $0x428] ss:$12 sps:$4 sm:$0xff]  }
 0x134   :  { %1958 = vmatprep.subr.bf16.mxu0 %v2668_v47  ;;  %2001 = vmatprep.subr.bf16.mxu1 %v2671_v48  ;;  %v2727_v47 = vld [vmem:[#allocation4 + $0x5a8] ss:$12 sps:$4 sm:$0xff]  }
 0x135   :  { %v2728_v48 = vld [vmem:[#allocation4 + $0x368] ss:$12 sps:$4 sm:$0xff]  }
 0x137   :  { %1959 = vmatpush2.bf16.msra.mxu0 %v2666_v49  ;;  %2002 = vmatpush2.bf16.msra.mxu1 %v2669_v50  ;;  %v2730_v49 = vld [vmem:[#allocation4 + $0x410] ss:$12 sps:$4 sm:$0xff]  }
 0x138   :  { %1960 = vmatprep.subr.bf16.mxu0 %v2674_v51  ;;  %2003 = vmatprep.subr.bf16.mxu1 %v2677_v52  ;;  %v2731_v50 = vld [vmem:[#allocation4 + $0x590] ss:$12 sps:$4 sm:$0xff]   ;;  %v2734_v52 = vld [vmem:[#allocation4 + $0x3f8] ss:$12 sps:$4 sm:$0xff]  }
 0x139   :  { %v2733_v51 = vld [vmem:[#allocation4 + $0x4d0] ss:$12 sps:$4 sm:$0xff]  }
 0x13b   :  { %1961 = vmatpush2.bf16.msra.mxu0 %v2672_v53  ;;  %2004 = vmatpush2.bf16.msra.mxu1 %v2675_v54  ;;  %v2735_v53 = vld [vmem:[#allocation4 + $0x578] ss:$12 sps:$4 sm:$0xff]  }
 0x13c   :  { %1962 = vmatprep.subr.bf16.mxu0 %v2680_v55  ;;  %2005 = vmatprep.subr.bf16.mxu1 %v2683_v56  ;;  %v2736_v54 = vld [vmem:[#allocation4 + $0x338] ss:$12 sps:$4 sm:$0xff]   ;;  %v2738_v56 = vld [vmem:[#allocation4 + $0x3e0] ss:$12 sps:$4 sm:$0xff]  }
 0x13d   :  { %v2737_v55 = vld [vmem:[#allocation4 + $0x4b8] ss:$12 sps:$4 sm:$0xff]  }
 0x13f   :  { %1963 = vmatpush2.bf16.msra.mxu0 %v2678_v57  ;;  %2006 = vmatpush2.bf16.msra.mxu1 %v2681_v58  ;;  %v2739_v57 = vld [vmem:[#allocation4 + $0x560] ss:$12 sps:$4 sm:$0xff]  }
 0x140   :  { %1964 = vmatprep.subr.bf16.mxu0 %v2686_v59  ;;  %2007 = vmatprep.subr.bf16.mxu1 %v2689_v60  ;;  %v2740_v58 = vld [vmem:[#allocation4 + $0x320] ss:$12 sps:$4 sm:$0xff]   ;;  %v2742_v60 = vld [vmem:[#allocation4 + $0x3c8] ss:$12 sps:$4 sm:$0xff]  }
 0x141   :  { %v2741_v59 = vld [vmem:[#allocation4 + $0x4a0] ss:$12 sps:$4 sm:$0xff]  }
 0x143   :  { %1965 = vmatpush2.bf16.msra.mxu0 %v2684_v61  ;;  %2008 = vmatpush2.bf16.msra.mxu1 %v2687_v62  ;;  %v2743_v61 = vld [vmem:[#allocation4 + $0x548] ss:$12 sps:$4 sm:$0xff]  }
 0x144   :  { %1966 = vmatprep.subr.bf16.mxu0 %v2692_v63  ;;  %2009 = vmatprep.subr.bf16.mxu1 %v2695_v0  ;;  %v2744_v62 = vld [vmem:[#allocation4 + $0x308] ss:$12 sps:$4 sm:$0xff]  }
 0x145   :  { %v2745_v63 = vld [vmem:[#allocation4 + $0x488] ss:$12 sps:$4 sm:$0xff]  }
 0x147   :  { %1967 = vmatpush2.bf16.msra.mxu0 %v2690_v1  ;;  %2010 = vmatpush2.bf16.msra.mxu1 %v2693_v3 }
 0x148   :  { %1968 = vmatprep.subr.bf16.mxu0 %v2698_v4  ;;  %2011 = vmatprep.subr.bf16.mxu1 %v2701_v6  ;;  %v524_v4 = vld [vmem:[%s2973_s4] sm:$0x7] }
 0x149   :  { %v533_v5 = vrot.slane %v524_v4, %v2856_v40 }
 0x14b   :  { %1969 = vmatpush2.bf16.msra.mxu0 %v2696_v7  ;;  %2012 = vmatpush2.bf16.msra.mxu1 %v2699_v9  ;;  %v529_v7 = vrot.slane %v524_v4, %v2859_v41  ;;  %v1227_v9 = vld [vmem:[%s2974_s5] sm:$0x7] }
 0x14c   :  { %1970 = vmatprep.subr.bf16.mxu0 %v2704_v13  ;;  %2013 = vmatprep.subr.bf16.mxu1 %v2707_v16 }
 0x14f   :  { %1971 = vmatpush2.bf16.msra.mxu0 %v2702_v17  ;;  %2014 = vmatpush2.bf16.msra.mxu1 %v2705_v11  ;;  %v1228_v17 = vunpack.c.l.bf16 %v1227_v9  ;;  %v2393_v9 = vld [vmem:[%s2974_s5 + $0x3] sm:$0x7] }
 0x150   :  { %1972 = vmatprep.subr.bf16.mxu0 %v2710_v19  ;;  %2015 = vmatprep.subr.bf16.mxu1 %v2713_v21 }
 0x151   :  { %v1237_v11 = vrot.slane %v1228_v17, %v2868_v44  ;;  %v1233_v21 = vrot.slane %v1228_v17, %v2859_v41  ;;  %v1241_v26 = vrot.slane %v1228_v17, %v2904_v2  ;;  %v2118_v17 = vunpack.c.l.bf16 %v2393_v9 }
 0x153   :  { %1973 = vmatpush2.bf16.msra.mxu0 %v2708_v43  ;;  %2016 = vmatpush2.bf16.msra.mxu1 %v2711_v24  ;;  %v537_v24 = vrot.slane %v524_v4, %v2868_v44  ;;  %v2296_v4 = vld [vmem:[%s2973_s4 + $0x3] sm:$0x7] }
 0x154   :  { %2439 = vmatprep.subr.bf16.mxu0 %v2714_v25  ;;  %2461 = vmatprep.subr.bf16.mxu1 %v2715_v28  ;;  %v1252_v28 = vrot.slane %v1237_v11, %v2859_v41  ;;  %v2127_v11 = vrot.slane %v2118_v17, %v2868_v44 }
 0x156   :  { %1975 = vmatmul.mubr.bf16.vlgmr.msra.gmra.mxu0 %v2914_v30  ;;  %2018 = vmatmul.mubr.bf16.vlgmr.msra.gmra.mxu1 %v2916_v46 }
 0x157   :  { %2440 = vmatpush3.bf16.msra.mxu0 %v2716_v29  ;;  %2060 = vmatprep.mubr.bf16.mxu0 %v2895_v10  ;;  %v2729_v10 = vld [vmem:[#allocation4 + $0x4e8] ss:$12 sps:$4 sm:$0xff]  }
 0x158   :  { %2462 = vmatpush3.bf16.msra.mxu1 %v2717_v27  ;;  %2101 = vmatprep.mubr.bf16.mxu1 %v2898_v12  ;;  %v2732_v12 = vld [vmem:[#allocation4 + $0x350] ss:$12 sps:$4 sm:$0xff]  }
 0x159   :  { %2441 = vmatprep.subr.bf16.mxu0 %v2718_v31  ;;  %2463 = vmatprep.subr.bf16.mxu1 %v2719_v32  ;;  %v1248_v31 = vrot.slane %v1233_v21, %v2859_v41 }
 0x15b   :  { %2442 = vmatpush3.bf16.msra.mxu0 %v2720_v33 }
 0x15c   :  { %2464 = vmatpush3.bf16.msra.mxu1 %v2721_v34  ;;  %2443 = vmatprep.subr.bf16.mxu0 %v2722_v35 }
 0x15d   :  { %2465 = vmatprep.subr.bf16.mxu1 %v2723_v36 }
 0x15f   :  { %2444 = vmatpush3.bf16.msra.mxu0 %v2724_v37 }
 0x160   :  { %2466 = vmatpush3.bf16.msra.mxu1 %v2725_v42  ;;  %2445 = vmatprep.subr.bf16.mxu0 %v2726_v45  ;;  %v1256_v42 = vrot.slane %v1241_v26, %v2859_v41 }
 0x161   :  { %2467 = vmatprep.subr.bf16.mxu1 %v2727_v47 }
 0x163   :  { %2446 = vmatpush3.bf16.msra.mxu0 %v2728_v48 }
 0x164   :  { %2468 = vmatpush3.bf16.msra.mxu1 %v2729_v10  ;;  %2447 = vmatprep.subr.bf16.mxu0 %v2730_v49 }
 0x165   :  { %2469 = vmatprep.subr.bf16.mxu1 %v2731_v50 }
 0x167   :  { %2448 = vmatpush3.bf16.msra.mxu0 %v2732_v12 }
 0x168   :  { %2470 = vmatpush3.bf16.msra.mxu1 %v2733_v51  ;;  %2449 = vmatprep.subr.bf16.mxu0 %v2734_v52 }
 0x169   :  { %2471 = vmatprep.subr.bf16.mxu1 %v2735_v53 }
 0x16b   :  { %2450 = vmatpush3.bf16.msra.mxu0 %v2736_v54 }
 0x16c   :  { %2472 = vmatpush3.bf16.msra.mxu1 %v2737_v55  ;;  %2451 = vmatprep.subr.bf16.mxu0 %v2738_v56 }
 0x16d   :  { %2473 = vmatprep.subr.bf16.mxu1 %v2739_v57 }
 0x16f   :  { %2452 = vmatpush3.bf16.msra.mxu0 %v2740_v58 }
 0x170   :  { %2474 = vmatpush3.bf16.msra.mxu1 %v2741_v59  ;;  %2453 = vmatprep.subr.bf16.mxu0 %v2742_v60 }
 0x171   :  { %2475 = vmatprep.subr.bf16.mxu1 %v2743_v61 }
 0x173   :  { %2454 = vmatpush3.bf16.msra.mxu0 %v2744_v62 }
 0x174   :  { %2476 = vmatpush3.bf16.msra.mxu1 %v2745_v63 }
 0x176   :  { %2061 = vmatmul.mubr.bf16.vlgmr.msra.gmra.mxu0 %v2914_v30 }
 0x177   :  { %2102 = vmatmul.mubr.bf16.vlgmr.msra.gmra.mxu1 %v2916_v46 }
 0x1b6   :  { %v1087_v0 = vpop.f32.mrf.mxu0  ;;  %v1130_v1 = vpop.f32.mrf.mxu1 }
 0x1b7   :  { %v1088_v16 = vadd.f32 %v1087_v0, %v529_v7 }
 0x1b8   :  { %v1089_v3 = vpop.f32.mrf.mxu0  ;;  %v1132_v6 = vpop.f32.mrf.mxu1 }
 0x1b9   :  { %v1090_v13 = vadd.f32 %v1089_v3, %v533_v5  ;;  %v1131_v20 = vadd.f32 %v1130_v1, %v1088_v16 }
 0x1ba   :  { %v1091_v8 = vpop.f32.mrf.mxu0  ;;  %v1134_v15 = vpop.f32.mrf.mxu1 }
 0x1bb   :  { %v1133_v39 = vadd.f32 %v1132_v6, %v1090_v13  ;;  %v1092_v22 = vadd.f32 %v1091_v8, %v529_v7  ;;  %v1221_v46 = vmax.f32 %v1131_v20, 0.0  ;;  %v1418_v7 = vrot.slane %v2296_v4, %v2859_v41 }
 0x1bc   :  { %v1093_v18 = vpop.f32.mrf.mxu0  ;;  %v1136_v14 = vpop.f32.mrf.mxu1 }
 0x1bd   :  { %v1094_v19 = vadd.f32 %v1093_v18, %v533_v5  ;;  %v1222_v38 = vmax.f32 %v1133_v39, 0.0  ;;  %v1135_v33 = vadd.f32 %v1134_v15, %v1092_v22  ;;  %v1257_v50 = vmul.f32 %v1248_v31, %v1221_v46 }
 0x1be   :  { %v1422_v5 = vrot.slane %v2296_v4, %v2856_v40  ;;  %v2123_v40 = vrot.slane %v2118_v17, %v2859_v41 }
 0x1bf   :  { %v1137_v29 = vadd.f32 %v1136_v14, %v1094_v19  ;;  %v1258_v45 = vmul.f32 %v1252_v28, %v1222_v38  ;;  %v1224_v12 = vmax.f32 %v1135_v33, 0.0  ;;  %v2142_v38 = vrot.slane %v2127_v11, %v2859_v41 }
 0x1c0   :  { %v2138_v46 = vrot.slane %v2123_v40, %v2859_v41 }
 0x1c1   :  { %v1225_v47 = vmax.f32 %v1137_v29, 0.0  ;;  %v1263_v57 = vadd.f32 %v1258_v45, %v1257_v50  ;;  %v1260_v58 = vmul.f32 %v1248_v31, %v1224_v12 }
 0x1c3   :  { %v1261_v54 = vmul.f32 %v1252_v28, %v1225_v47 }
 0x1c5   :  { %v1267_v62 = vadd.f32 %v1261_v54, %v1260_v58 }
 0x1d6   :  { %v2411_v43 = vpop.f32.mrf.mxu0  ;;  %v2433_v23 = vpop.f32.mrf.mxu1 }
 0x1d8   :  { %v2412_v25 = vpop.f32.mrf.mxu0  ;;  %v2434_v27 = vpop.f32.mrf.mxu1 }
 0x1d9   :  { %v2413_v30 = vadd.f32 %v2412_v25, %v2411_v43  ;;  %v2435_v35 = vadd.f32 %v2434_v27, %v2433_v23  ;;  %v1426_v23 = vrot.slane %v2296_v4, %v2868_v44  ;;  %v2131_v25 = vrot.slane %v2118_v17, %v2904_v2 }
 0x1da   :  { %v2414_v32 = vpop.f32.mrf.mxu0  ;;  %v2436_v36 = vpop.f32.mrf.mxu1 }
 0x1db   :  { %v1174_v34 = vadd.f32 %v2413_v30, %v537_v24  ;;  %v2146_v44 = vrot.slane %v2131_v25, %v2859_v41 }
 0x1dc   :  { %v2415_v37 = vpop.f32.mrf.mxu0  ;;  %v2437_v49 = vpop.f32.mrf.mxu1 }
 0x1dd   :  { %v1215_v48 = vadd.f32 %v2435_v35, %v1174_v34  ;;  %v2416_v10 = vadd.f32 %v2415_v37, %v2414_v32  ;;  %v2438_v53 = vadd.f32 %v2437_v49, %v2436_v36 }
 0x1df   :  { %v1223_v51 = vmax.f32 %v1215_v48, 0.0  ;;  %v1177_v52 = vadd.f32 %v2416_v10, %v537_v24 }
 0x1e1   :  { %v1218_v55 = vadd.f32 %v2438_v53, %v1177_v52  ;;  %v1259_v56 = vmul.f32 %v1256_v42, %v1223_v51 }
 0x1e3   :  { %v1226_v59 = vmax.f32 %v1218_v55, 0.0  ;;  %v1264_v60 = vadd.f32 %v1263_v57, %v1259_v56 }
 0x1e5   :  { %1265 = vadd.xlane.f32.xlu0 %v1264_v60  ;;  %v1262_v61 = vmul.f32 %v1256_v42, %v1226_v59  ;;  %v2295_v60 = vld [vmem:[%s2975_s6] ss:$0 sm:$0xff] }
 0x1e7   :  { %v1268_v63 = vadd.f32 %v1267_v62, %v1262_v61 }
 0x1e9   :  { %1269 = vadd.xlane.f32.xlu0 %v1268_v63 }
 0x216   :  { %v1976_v0 = vpop.f32.mrf.mxu0  ;;  %v2019_v1 = vpop.f32.mrf.mxu1 }
 0x217   :  { %v1977_v16 = vadd.f32 %v1976_v0, %v1418_v7 }
 0x218   :  { %v1978_v3 = vpop.f32.mrf.mxu0  ;;  %v2021_v6 = vpop.f32.mrf.mxu1 }
 0x219   :  { %v1979_v13 = vadd.f32 %v1978_v3, %v1422_v5  ;;  %v2020_v20 = vadd.f32 %v2019_v1, %v1977_v16 }
 0x21a   :  { %v1980_v8 = vpop.f32.mrf.mxu0  ;;  %v2023_v15 = vpop.f32.mrf.mxu1 }
 0x21b   :  { %v2022_v39 = vadd.f32 %v2021_v6, %v1979_v13  ;;  %v1981_v43 = vadd.f32 %v1980_v8, %v1418_v7  ;;  %v2110_v27 = vmax.f32 %v2020_v20, 0.0 }
 0x21c   :  { %v1982_v18 = vpop.f32.mrf.mxu0  ;;  %v2025_v14 = vpop.f32.mrf.mxu1 }
 0x21d   :  { %v1983_v19 = vadd.f32 %v1982_v18, %v1422_v5  ;;  %v2111_v26 = vmax.f32 %v2022_v39, 0.0  ;;  %v2024_v32 = vadd.f32 %v2023_v15, %v1981_v43  ;;  %v2147_v48 = vmul.f32 %v2138_v46, %v2110_v27 }
 0x21f   :  { %v2026_v28 = vadd.f32 %v2025_v14, %v1983_v19  ;;  %v2148_v37 = vmul.f32 %v2142_v38, %v2111_v26  ;;  %v2113_v10 = vmax.f32 %v2024_v32, 0.0 }
 0x221   :  { %v2114_v42 = vmax.f32 %v2026_v28, 0.0  ;;  %v2153_v54 = vadd.f32 %v2148_v37, %v2147_v48  ;;  %v2150_v55 = vmul.f32 %v2138_v46, %v2113_v10 }
 0x223   :  { %v2151_v51 = vmul.f32 %v2142_v38, %v2114_v42 }
 0x225   :  { %v2157_v41 = vadd.f32 %v2151_v51, %v2150_v55 }
 0x236   :  { %v2455_v21 = vpop.f32.mrf.mxu0 }
 0x237   :  { %v2477_v22 = vpop.f32.mrf.mxu1 }
 0x238   :  { %v2456_v24 = vpop.f32.mrf.mxu0 }
 0x239   :  { %v2457_v29 = vadd.f32 %v2456_v24, %v2455_v21  ;;  %v2478_v30 = vpop.f32.mrf.mxu1 }
 0x23a   :  { %v2458_v31 = vpop.f32.mrf.mxu0  ;;  %v2479_v34 = vadd.f32 %v2478_v30, %v2477_v22 }
 0x23b   :  { %v2063_v33 = vadd.f32 %v2457_v29, %v1426_v23  ;;  %v2480_v35 = vpop.f32.mrf.mxu1 }
 0x23c   :  { %v2459_v36 = vpop.f32.mrf.mxu0 }
 0x23d   :  { %v2104_v2 = vadd.f32 %v2479_v34, %v2063_v33  ;;  %v2460_v45 = vadd.f32 %v2459_v36, %v2458_v31  ;;  %v2481_v47 = vpop.f32.mrf.mxu1 }
 0x23e   :  { %v2482_v12 = vadd.f32 %v2481_v47, %v2480_v35 }
 0x23f   :  { %v2112_v49 = vmax.f32 %v2104_v2, 0.0  ;;  %v2066_v50 = vadd.f32 %v2460_v45, %v1426_v23 }
 0x241   :  { %v2107_v52 = vadd.f32 %v2482_v12, %v2066_v50  ;;  %v2149_v53 = vmul.f32 %v2146_v44, %v2112_v49 }
 0x243   :  { %v2115_v56 = vmax.f32 %v2107_v52, 0.0  ;;  %v2154_v57 = vadd.f32 %v2153_v54, %v2149_v53 }
 0x245   :  { %2155 = vadd.xlane.f32.xlu1 %v2154_v57  ;;  %v2152_v58 = vmul.f32 %v2146_v44, %v2115_v56 }
 0x247   :  { %v2158_v59 = vadd.f32 %v2157_v41, %v2152_v58 }
 0x249   :  { %2159 = vadd.xlane.f32.xlu1 %v2158_v59 }
 0x26e   :  { %v1266_v61 = vpop.xlane.xlu0 %1265 }
 0x26f   :  { %v1278_v62 = vadd.f32 %v2295_v60, %v1266_v61 }
 0x271   :  { %1281 = vst.msk [vmem:[%s2976_s7] sm:$0xff] %vm1280_vm1, %v1278_v62 }
 0x272   :  { %v1270_v63 = vpop.xlane.xlu0 %1269 }
 0x273   :  { %v1279_v0 = vadd.f32 %v2295_v60, %v1270_v63 }
 0x275   :  { %1282 = vst.msk [vmem:[%s2976_s7 + $0x8] sm:$0xff] %vm1280_vm1, %v1279_v0 }
 0x2ce   :  { %v2156_v1 = vpop.xlane.xlu1 %2155 }
 0x2cf   :  { %v2168_v3 = vadd.f32 %v2295_v60, %v2156_v1 }
 0x2d1   :  { %2171 = vst.msk [vmem:[%s2976_s7] sm:$0xff] %vm2170_vm2, %v2168_v3 }
 0x2d2   :  { %v2160_v4 = vpop.xlane.xlu1 %2159 }
 0x2d3   :  { %v2169_v5 = vadd.f32 %v2295_v60, %v2160_v4 }
 0x2d5   :  { %2172 = vst.msk [vmem:[%s2976_s7 + $0x8] sm:$0xff] %vm2170_vm2, %v2169_v5 }
 0x2d6   :  { %2177 = vsyncpa [#allocation3], 1 }
 0x2d7   :  { %2178 = vsyncpa [#allocation5], 1 }

</bundles_post_ra>
